<compile_context>
chip_gen: v6e
topology: v6e:2x2x1
jax: 0.10.0
libtpu: 0.0.40
codegen_flags: <defaults>
</compile_context>

<pallas_src>
import functools

import jax
import jax.numpy as jnp
from jax import lax
from jax.experimental import pallas as pl
from jax.experimental.pallas import tpu as pltpu


TARGET_BLOCK_BYTES = 2 * 1024 * 1024   # ~per-buffer payload; hits HBM roofline on all gens
VMEM_LIMIT_BYTES = 48 * 1024 * 1024    # explicit scoped limit; fits v7x's 64 MiB/TC


def _cln_kernel(x_ref, g_ref, b_ref, o_ref, *, eps):
    # x_ref block: (nB, C, tS); channel axis on sublanes, spatial axis on lanes.
    x = x_ref[...].astype(jnp.float32)                        # (nB, C, tS)

    mean = jnp.mean(x, axis=1, keepdims=True)                 # (nB, 1, tS)
    dif = x - mean
    var = jnp.mean(dif * dif, axis=1, keepdims=True)          # two-pass: exact, >= 0
    inv_std = lax.rsqrt(var + eps)                            # EUP rsqrt (no sqrt+div chain)

    y = dif * inv_std                                         # (nB, C, tS)
    # Per-channel affine; (C, 1) broadcasts across batch and lanes.
    o_ref[...] = (g_ref[...] * y + b_ref[...]).astype(o_ref.dtype)


def _choose_tiles(N, C, S, target_bytes=TARGET_BLOCK_BYTES):
    """Pick (nB, tS) so one block moves ~target_bytes (budgeted in f32)."""
    bpe = 4  # budget in f32: also covers the in-kernel upcast temp for bf16 inputs
    if S <= 128:
        tS = S                                    # full (legal) extent below one lane vreg
    else:
        want = max(128, target_bytes // (C * bpe))
        tS = max(128, (want // 128) * 128)        # lane axis: multiple of 128
        if tS >= S:
            tS = S                                # whole plane already fits the byte budget
    per_image = C * tS * bpe
    nB = int(max(1, min(N, target_bytes // max(per_image, 1))))
    return nB, tS


def conv_layer_norm(x_nchw, gamma, beta, *, eps=1e-6):
    """ConvLayerNorm forward.  x: (N, C, H, W); gamma/beta: (C, 1, 1)."""
    N, C, H, W = x_nchw.shape
    S = H * W
    nB, tS = _choose_tiles(N, C, S)
    grid = (pl.cdiv(N, nB), pl.cdiv(S, tS))

    x = x_nchw.reshape(N, C, S)                   # contiguous trailing-dim merge (free)
    g = gamma.reshape(C, 1).astype(jnp.float32)
    b = beta.reshape(C, 1).astype(jnp.float32)

    # Three-deep input pipelining only pays off on long streams; keep the
    # default double buffer for tiny grids.
    act_kwargs = {}
    if grid[0] * grid[1] > 2:
        act_kwargs = dict(pipeline_mode=pl.Buffered(3))

    kern = functools.partial(_cln_kernel, eps=float(eps))

    out = pl.pallas_call(
        kern,
        out_shape=jax.ShapeDtypeStruct((N, C, S), x_nchw.dtype),
        grid=grid,
        in_specs=[
            pl.BlockSpec((nB, C, tS), lambda n, s: (n, 0, s), **act_kwargs),  # activations
            pl.BlockSpec((C, 1), lambda n, s: (0, 0)),                        # gamma (resident)
            pl.BlockSpec((C, 1), lambda n, s: (0, 0)),                        # beta  (resident)
        ],
        out_specs=pl.BlockSpec((nB, C, tS), lambda n, s: (n, 0, s)),
        compiler_params=pltpu.CompilerParams(
            dimension_semantics=("parallel", "parallel"),
            vmem_limit_bytes=VMEM_LIMIT_BYTES),
    )(x, g, b)

    return out.reshape(N, C, H, W)


def conv_layer_norm_ref(x, gamma, beta, eps=1e-6):
    """Pure-JAX reference mirroring the PyTorch forward exactly (two-pass)."""
    mean = x.mean(axis=1, keepdims=True)
    dif = x - mean
    var = (dif * dif).mean(axis=1, keepdims=True)
    xn = dif / jnp.sqrt(var + eps)
    return gamma[jnp.newaxis] * xn + beta[jnp.newaxis]


if __name__ == "__main__":
    import numpy as np

    # Small smoke-test shape (tiling decisions should be benchmarked at
    # production H*W / C; this only validates correctness + clean compile).
    N, C, H, W = 2, 4, 16, 16

    key = jax.random.PRNGKey(0)
    kx, kg, kb = jax.random.split(key, 3)
    x = jax.random.normal(kx, (N, C, H, W), jnp.float32)               # NCHW, like PyTorch
    gamma = 1.0 + 0.1 * jax.random.normal(kg, (C, 1, 1), jnp.float32)  # ConvLayerNorm.a
    beta = 0.1 * jax.random.normal(kb, (C, 1, 1), jnp.float32)         # ConvLayerNorm.b

    out = conv_layer_norm(x, gamma, beta)
    jax.block_until_ready(out)
    assert out.shape == (N, C, H, W)

    ref = conv_layer_norm_ref(x, gamma, beta)
    np.testing.assert_allclose(np.asarray(out), np.asarray(ref), atol=1e-4, rtol=1e-4)
    print("KERNEL_OK")
</pallas_src>

<mosaic_0001>
module attributes {stable_mosaic.version = 11 : i64} {
  func.func @_cln_kernel(%arg0: i32, %arg1: i32, %arg2: memref<2x4x256xf32, #tpu.memory_space<vmem>>, %arg3: memref<4x1xf32, #tpu.memory_space<vmem>>, %arg4: memref<4x1xf32, #tpu.memory_space<vmem>>, %arg5: memref<2x4x256xf32, #tpu.memory_space<vmem>>) attributes {dimension_semantics = [#tpu.dimension_semantics<parallel>, #tpu.dimension_semantics<parallel>], iteration_bounds = array<i64: 1, 1>, scalar_prefetch = 0 : i64, scratch_operands = 0 : i64, tpu.core_type = #tpu.core_type<tc>, window_params = [{transform_indices = @transform_0, window_bounds = array<i64: 2, 4, 256>}, {pipeline_mode = #tpu.pipeline_mode<synchronous>, transform_indices = @transform_1, window_bounds = array<i64: 4, 1>}, {pipeline_mode = #tpu.pipeline_mode<synchronous>, transform_indices = @transform_2, window_bounds = array<i64: 4, 1>}, {transform_indices = @transform_3, window_bounds = array<i64: 2, 4, 256>}]} {
    %c0 = arith.constant 0 : index
    %c0_0 = arith.constant 0 : index
    %c0_1 = arith.constant 0 : index
    %0 = vector.load %arg2[%c0, %c0_0, %c0_1] : memref<2x4x256xf32, #tpu.memory_space<vmem>>, vector<2x4x256xf32>
    %cst = arith.constant dense<0.000000e+00> : vector<2x256xf32>
    %1 = vector.multi_reduction <add>, %0, %cst [1] : vector<2x4x256xf32> to vector<2x256xf32>
    %2 = vector.shape_cast %1 : vector<2x256xf32> to vector<2x1x256xf32>
    %cst_2 = arith.constant 4.000000e+00 : f32
    %3 = vector.broadcast %cst_2 : f32 to vector<2x1x256xf32>
    %4 = arith.divf %2, %3 : vector<2x1x256xf32>
    %5 = vector.broadcast %4 : vector<2x1x256xf32> to vector<2x4x256xf32>
    %6 = arith.subf %0, %5 : vector<2x4x256xf32>
    %7 = arith.mulf %6, %6 : vector<2x4x256xf32>
    %cst_3 = arith.constant dense<0.000000e+00> : vector<2x256xf32>
    %8 = vector.multi_reduction <add>, %7, %cst_3 [1] : vector<2x4x256xf32> to vector<2x256xf32>
    %9 = vector.shape_cast %8 : vector<2x256xf32> to vector<2x1x256xf32>
    %cst_4 = arith.constant 4.000000e+00 : f32
    %10 = vector.broadcast %cst_4 : f32 to vector<2x1x256xf32>
    %11 = arith.divf %9, %10 : vector<2x1x256xf32>
    %cst_5 = arith.constant 9.99999997E-7 : f32
    %12 = vector.broadcast %cst_5 : f32 to vector<2x1x256xf32>
    %13 = arith.addf %11, %12 : vector<2x1x256xf32>
    %14 = math.rsqrt %13 : vector<2x1x256xf32>
    %15 = vector.broadcast %14 : vector<2x1x256xf32> to vector<2x4x256xf32>
    %16 = arith.mulf %6, %15 : vector<2x4x256xf32>
    %c0_6 = arith.constant 0 : index
    %c0_7 = arith.constant 0 : index
    %17 = vector.load %arg3[%c0_6, %c0_7] : memref<4x1xf32, #tpu.memory_space<vmem>>, vector<4x1xf32>
    %18 = vector.shape_cast %17 : vector<4x1xf32> to vector<1x4x1xf32>
    %19 = vector.broadcast %18 : vector<1x4x1xf32> to vector<2x4x256xf32>
    %20 = arith.mulf %19, %16 : vector<2x4x256xf32>
    %c0_8 = arith.constant 0 : index
    %c0_9 = arith.constant 0 : index
    %21 = vector.load %arg4[%c0_8, %c0_9] : memref<4x1xf32, #tpu.memory_space<vmem>>, vector<4x1xf32>
    %22 = vector.shape_cast %21 : vector<4x1xf32> to vector<1x4x1xf32>
    %23 = vector.broadcast %22 : vector<1x4x1xf32> to vector<2x4x256xf32>
    %24 = arith.addf %20, %23 : vector<2x4x256xf32>
    %c0_10 = arith.constant 0 : index
    %c0_11 = arith.constant 0 : index
    %c0_12 = arith.constant 0 : index
    %25 = vector.load %arg5[%c0_10, %c0_11, %c0_12] : memref<2x4x256xf32, #tpu.memory_space<vmem>>, vector<2x4x256xf32>
    tpu.vector_store %arg5[%c0_10, %c0_11, %c0_12], %24 {strides = array<i32>} : memref<2x4x256xf32, #tpu.memory_space<vmem>>, vector<2x4x256xf32>,
    return
  }
  func.func @transform_0(%arg0: i32, %arg1: i32) -> (i32, i32, i32) {
    %c0_i32 = arith.constant 0 : i32
    %c0_i32_0 = arith.constant 0 : i32
    return %arg0, %c0_i32, %arg1 : i32, i32, i32
  }
  func.func @transform_1(%arg0: i32, %arg1: i32) -> (i32, i32) {
    %c0_i32 = arith.constant 0 : i32
    %c0_i32_0 = arith.constant 0 : i32
    %c0_i32_1 = arith.constant 0 : i32
    return %c0_i32, %c0_i32_0 : i32, i32
  }
  func.func @transform_2(%arg0: i32, %arg1: i32) -> (i32, i32) {
    %c0_i32 = arith.constant 0 : i32
    %c0_i32_0 = arith.constant 0 : i32
    %c0_i32_1 = arith.constant 0 : i32
    return %c0_i32, %c0_i32_0 : i32, i32
  }
  func.func @transform_3(%arg0: i32, %arg1: i32) -> (i32, i32, i32) {
    %c0_i32 = arith.constant 0 : i32
    %c0_i32_0 = arith.constant 0 : i32
    return %arg0, %c0_i32, %arg1 : i32, i32, i32
  }
}

</mosaic_0001>

<bundles_post_ra>
// kernel: tpu_custom_call.1
= control target key start
LH: loop header
LB: loop body
LE: loop exit
PB: predicated region body
PF: predicated region fallthrough
CT: control target
= control target key end

     0   :  { %8 = vsyncpa [#allocation3], 0  ;;  %s303_s0 = inlined_call_operand.hbm [shape: f32[2,4,256], index: 0, kind: input, shape index: {}]   ;;  %s304_s1 = inlined_call_operand.vmem [shape: f32[4,1], index: 1, kind: input, shape index: {}]   ;;  %s305_s2 = inlined_call_operand.vmem [shape: f32[4,1], index: 2, kind: input, shape index: {}]   ;;  %s306_s3 = inlined_call_operand.hbm [shape: f32[2,4,256], index: 3, kind: output, shape index: {}]  }
   0x1   :  { %9 = vsyncpa [#allocation4], 0  ;;  %s252_s12 = smov [#allocation2]  }
   0x2   :  { %s15_s13 = sshll.u32 %s252_s12, 4  ;;  %s16_s13 = int_to_ptr.vmem [resolvable:$true] %s15_s13 }
   0x3   :  { %s216_s14 = scalar_lea.vmem %s16_s13, 256  ;;  %p221_p1 = scmp.lt.s32.totalorder %s16_s13, %s16_s13 }
   0x4   :  { %p217_p0 = scmp.ne.s32.totalorder %s16_s13, %s216_s14  ;;  %p222_p2 = scmp.lt.s32.totalorder %s216_s14, %s216_s14 }
   0x6   :  { %p223_p3 = por %p222_p2, %p221_p1 }
   0x8   :  { %p224_p4 = pnand %p223_p3, %p217_p0 }
   0xa   :  { %227 = shalt.err (!%p224_p4)
}
   0xb   :  { %s253_s15 = smov 128   ;;  %s254_s16 = smov 8  }
   0xc   :  { %21 = dma.hbm_to_vmem [thread:$0]  %s303_s0, 256, %s16_s13, [#allocation3], %s253_s15, %s253_s15, %s254_s16  }
   0xd   :  { %248 = dma.done.wait [#allocation3], 256  }
   0xe   :  { %249 = vsyncadd [#allocation3], 4294967040  ;;  %v255_v0 = vmov 0   ;;  %v139_v1 = vld [vmem:[%s304_s1] sm:$0xf]  ;;  %v30_v4 = vld [vmem:[#allocation2 + $0x8] sm:$0xff] }
   0xf   :  { %197 = vset.pattern.permute.xlu0 %v255_v0  ;;  %v155_v2 = vld [vmem:[%s305_s2] sm:$0xf]  ;;  %vm37_vm0 = vcmask 1043456   ;;  %v34_v6 = vcombine.high %v30_v4, %v30_v4  ;;  %s256_s0 = smov [#allocation5]  }
  0x10   :  { %142 = vperm.xlu0 %197, %v139_v1   ;;  %v29_v3 = vld [vmem:[#allocation2] sm:$0xff]  ;;  %v52_v9 = vsel %vm37_vm0, %v30_v4, 0.0  ;;  %s180_s1 = sshll.u32 %s256_s0, 4  ;;  %s181_s1 = int_to_ptr.vmem [resolvable:$true] %s180_s1 }
  0x11   :  { %v33_v5 = vcombine.high %v29_v3, %v29_v3  ;;  %v38_v7 = vsel %vm37_vm0, %v29_v3, 0.0  ;;  %v59_v10 = vsel %vm37_vm0, %v34_v6, 0.0  ;;  %v53_v13 = vrot.slane %v52_v9, 4  ;;  %s228_s2 = scalar_lea.vmem %s181_s1, 256  ;;  %p233_p6 = scmp.lt.s32.totalorder %s181_s1, %s181_s1 }
  0x12   :  { %v39_v11 = vrot.slane %v38_v7, 4  ;;  %v60_v14 = vrot.slane %v59_v10, 4  ;;  %p229_p5 = scmp.ne.s32.totalorder %s181_s1, %s228_s2  ;;  %p234_p7 = scmp.lt.s32.totalorder %s228_s2, %s228_s2 }
  0x13   :  { %v45_v8 = vsel %vm37_vm0, %v33_v5, 0.0  ;;  %v54_v17 = vadd.f32 %v53_v13, %v52_v9 }
  0x14   :  { %158 = vperm.xlu0 %197, %v155_v2   ;;  %v46_v12 = vrot.slane %v45_v8, 4  ;;  %v40_v15 = vadd.f32 %v39_v11, %v38_v7  ;;  %v61_v18 = vadd.f32 %v60_v14, %v59_v10  ;;  %p235_p8 = por %p234_p7, %p233_p6 }
  0x15   :  { %v55_v21 = vrot.slane %v54_v17, 2 }
  0x16   :  { %v47_v16 = vadd.f32 %v46_v12, %v45_v8  ;;  %v41_v19 = vrot.slane %v40_v15, 2  ;;  %v62_v22 = vrot.slane %v61_v18, 2  ;;  %p236_p9 = pnand %p235_p8, %p229_p5 }
  0x17   :  { %v56_v25 = vadd.f32 %v55_v21, %v54_v17 }
  0x18   :  { %v48_v20 = vrot.slane %v47_v16, 2  ;;  %v42_v23 = vadd.f32 %v41_v19, %v40_v15  ;;  %v63_v26 = vadd.f32 %v62_v22, %v61_v18 }
  0x19   :  { %v57_v29 = vrot.slane %v56_v25, 1 }
  0x1a   :  { %v49_v24 = vadd.f32 %v48_v20, %v47_v16  ;;  %v43_v27 = vrot.slane %v42_v23, 1  ;;  %v64_v30 = vrot.slane %v63_v26, 1 }
  0x1b   :  { %v58_v33 = vadd.f32 %v57_v29, %v56_v25 }
  0x1c   :  { %v50_v28 = vrot.slane %v49_v24, 1  ;;  %v44_v31 = vadd.f32 %v43_v27, %v42_v23  ;;  %v65_v34 = vadd.f32 %v64_v30, %v63_v26 }
  0x1d   :  { %v69_v37 = vmul.f32 0.25, %v58_v33 }
  0x1e   :  { %v51_v32 = vadd.f32 %v50_v28, %v49_v24  ;;  %v67_v35 = vmul.f32 0.25, %v44_v31  ;;  %v70_v38 = vmul.f32 0.25, %v65_v34 }
  0x20   :  { %v68_v36 = vmul.f32 0.25, %v51_v32  ;;  %v76_v40 = vcombine.low %v69_v37, %v70_v38 }
  0x22   :  { %v75_v39 = vcombine.low %v67_v35, %v68_v36  ;;  %v80_v42 = vsub.f32 %v30_v4, %v76_v40 }
  0x24   :  { %v79_v41 = vsub.f32 %v29_v3, %v75_v39  ;;  %v82_v44 = vmul.f32 %v80_v42, %v80_v42 }
  0x26   :  { %v81_v43 = vmul.f32 %v79_v41, %v79_v41  ;;  %v86_v46 = vcombine.high %v82_v44, %v82_v44  ;;  %v103_v48 = vsel %vm37_vm0, %v82_v44, 0.0 }
  0x27   :  { %v104_v52 = vrot.slane %v103_v48, 4 }
  0x28   :  { %v85_v45 = vcombine.high %v81_v43, %v81_v43  ;;  %v89_v47 = vsel %vm37_vm0, %v81_v43, 0.0  ;;  %v110_v51 = vsel %vm37_vm0, %v86_v46, 0.0 }
  0x29   :  { %v90_v50 = vrot.slane %v89_v47, 4  ;;  %v111_v54 = vrot.slane %v110_v51, 4  ;;  %v105_v56 = vadd.f32 %v104_v52, %v103_v48 }
  0x2a   :  { %v96_v49 = vsel %vm37_vm0, %v85_v45, 0.0 }
  0x2b   :  { %v97_v53 = vrot.slane %v96_v49, 4  ;;  %v91_v55 = vadd.f32 %v90_v50, %v89_v47  ;;  %v112_v58 = vadd.f32 %v111_v54, %v110_v51  ;;  %v106_v60 = vrot.slane %v105_v56, 2 }
  0x2d   :  { %v98_v57 = vadd.f32 %v97_v53, %v96_v49  ;;  %v92_v59 = vrot.slane %v91_v55, 2  ;;  %v113_v62 = vrot.slane %v112_v58, 2  ;;  %v107_v0 = vadd.f32 %v106_v60, %v105_v56 }
  0x2f   :  { %v99_v61 = vrot.slane %v98_v57, 2  ;;  %v93_v63 = vadd.f32 %v92_v59, %v91_v55  ;;  %v114_v2 = vadd.f32 %v113_v62, %v112_v58  ;;  %v108_v4 = vrot.slane %v107_v0, 1 }
  0x31   :  { %v100_v1 = vadd.f32 %v99_v61, %v98_v57  ;;  %v94_v3 = vrot.slane %v93_v63, 1  ;;  %v115_v6 = vrot.slane %v114_v2, 1  ;;  %v109_v8 = vadd.f32 %v108_v4, %v107_v0 }
  0x33   :  { %v101_v5 = vrot.slane %v100_v1, 1  ;;  %v95_v7 = vadd.f32 %v94_v3, %v93_v63  ;;  %v116_v10 = vadd.f32 %v115_v6, %v114_v2  ;;  %v119_v12 = vmul.f32 0.25, %v109_v8 }
  0x35   :  { %v102_v9 = vadd.f32 %v101_v5, %v100_v1  ;;  %v117_v11 = vmul.f32 0.25, %v95_v7  ;;  %v120_v14 = vmul.f32 0.25, %v116_v10  ;;  %v123_v16 = vadd.f32 1e-06, %v119_v12 }
  0x37   :  { %v118_v13 = vmul.f32 0.25, %v102_v9  ;;  %v121_v15 = vadd.f32 1e-06, %v117_v11  ;;  %v124_v18 = vadd.f32 1e-06, %v120_v14 }
  0x39   :  { %v122_v17 = vadd.f32 1e-06, %v118_v13  ;;  %200 = vrsqrt.f32 %v121_v15 }
  0x3a   :  { %202 = vrsqrt.f32 %v123_v16 }
  0x3b   :  { %204 = vrsqrt.f32 %v122_v17 }
  0x3c   :  { %206 = vrsqrt.f32 %v124_v18 }
  0x46   :  { %v201_v19 = vpop.eup %200 }
  0x47   :  { %v203_v20 = vpop.eup %202 }
  0x48   :  { %v205_v21 = vpop.eup %204 }
  0x49   :  { %v207_v22 = vpop.eup %206  ;;  %v133_v23 = vcombine.low %v201_v19, %v205_v21 }
  0x4a   :  { %v134_v24 = vcombine.low %v203_v20, %v207_v22 }
  0x4b   :  { %v137_v25 = vmul.f32 %v133_v23, %v79_v41 }
  0x4c   :  { %v138_v26 = vmul.f32 %v134_v24, %v80_v42 }
  0x4d   :  { %v147_v27 = vcombine.high %v137_v25, %v137_v25 }
  0x4e   :  { %v148_v28 = vcombine.high %v138_v26, %v138_v26 }
  0x8b   :  { %v143_v29 = vpop.permute.xlu0 %142 }
  0x8c   :  { %v151_v30 = vmul.f32 %v143_v29, %v137_v25  ;;  %v152_v31 = vmul.f32 %v147_v27, %v143_v29  ;;  %v153_v32 = vmul.f32 %v143_v29, %v138_v26  ;;  %v154_v33 = vmul.f32 %v148_v28, %v143_v29 }
  0x8f   :  { %v159_v34 = vpop.permute.xlu0 %158 }
  0x90   :  { %v161_v35 = vadd.f32 %v159_v34, %v151_v30  ;;  %v162_v36 = vadd.f32 %v159_v34, %v152_v31  ;;  %v163_v37 = vadd.f32 %v159_v34, %v153_v32  ;;  %v164_v38 = vadd.f32 %v159_v34, %v154_v33 }
  0x92   :  { %v169_v39 = vcombine.low %v161_v35, %v162_v36  ;;  %v170_v40 = vcombine.low %v163_v37, %v164_v38 }
  0x94   :  { %173 = vst [vmem:[#allocation5] sm:$0xff] %v169_v39  ;;  %174 = vst [vmem:[#allocation5 + $0x8] sm:$0xff] %v170_v40 }
  0x95   :  { %239 = shalt.err (!%p236_p9)
}
  0x96   :  { %186 = dma.vmem_to_hbm [thread:$0]  %s181_s1, 256, %s306_s3, [#allocation4], %s253_s15, %s253_s15, %s254_s16  }
  0x97   :  { %250 = dma.done.wait [#allocation4], 256  }
  0x98   :  { %251 = vsyncadd [#allocation4], 4294967040 }
  0x99   :  { %190 = vsyncpa [#allocation3], 1 }
  0x9a   :  { %191 = vsyncpa [#allocation4], 1 }

</bundles_post_ra>
